<compile_context>
chip_gen: v6e
topology: v6e:2x2x1
jax: 0.10.0
libtpu: 0.0.40
codegen_flags: <defaults>
</compile_context>

<pallas_src>
import math
import functools

import jax
import jax.numpy as jnp
from jax.experimental import pallas as pl
from jax.experimental.pallas import tpu as pltpu

LN_EPS = 1e-5  # PyTorch nn.LayerNorm default


def _layernorm(x, eps=LN_EPS):
    mu = jnp.mean(x, axis=-1, keepdims=True)
    var = jnp.mean((x - mu) ** 2, axis=-1, keepdims=True)
    return (x - mu) * jax.lax.rsqrt(var + eps)


def _gelu_exact(x):
    # nn.GELU() default (erf form) -- kept exact to match PyTorch semantics.
    return 0.5 * x * (1.0 + jax.lax.erf(x * (1.0 / math.sqrt(2.0))))


def encoder_block_kernel(n_head,
                         x_ref, scale_ref, shift_ref,
                         wqkv_ref, bqkv_ref,
                         wp_ref, bp_ref,
                         g2_ref, be2_ref,
                         w1_ref, b1_ref, w2_ref, b2_ref,
                         y_ref, att_ref):
    Bb, T, C = x_ref.shape           # block_b batch elements per grid step
    H = n_head
    D = C // H
    M = Bb * T                       # rows fed to every dense matmul

    x3 = x_ref[...]                                             # (Bb, T, C) f32

    # ---- AdaLayerNorm: LN (no affine) * (1 + scale) + shift -----------------
    h3 = _layernorm(x3) * (1.0 + scale_ref[...]) + shift_ref[...]
    h2d = h3.reshape(M, C)           # fold batch into the matmul M dimension

    # ---- FullAttention: fused QKV projection (bf16 MXU, f32 accumulation) ---
    qkv = jnp.dot(h2d.astype(jnp.bfloat16), wqkv_ref[...],
                  preferred_element_type=jnp.float32) + bqkv_ref[...]
    q = qkv[:, 0 * C:1 * C].reshape(Bb, T, C)
    k = qkv[:, 1 * C:2 * C].reshape(Bb, T, C)
    v = qkv[:, 2 * C:3 * C].reshape(Bb, T, C)

    inv_sqrt_d = 1.0 / math.sqrt(D)
    att_acc = jnp.zeros((Bb, T, T), jnp.float32)
    # Output projection is accumulated head-by-head (full-width (M, C) adds),
    # starting from the broadcast projection bias -- no D-wide scratch stores.
    y_attn = jnp.zeros((M, C), jnp.float32) + bp_ref[...]

    # Static loop over heads (H is small).  Scores contract q/k over their last
    # dim directly (no materialised k.T transpose), batched over sub-batches.
    for hh in range(H):
        sl = slice(hh * D, (hh + 1) * D)
        qh, kh, vh = q[:, :, sl], k[:, :, sl], v[:, :, sl]      # (Bb, T, D)
        s = jnp.einsum("bqd,bkd->bqk", qh, kh,
                       preferred_element_type=jnp.float32) * inv_sqrt_d
        s = s - jnp.max(s, axis=-1, keepdims=True)
        p = jnp.exp(s)
        denom = jnp.sum(p, axis=-1, keepdims=True)
        # EUP approximate reciprocal + one Newton step on the tiny (rows, 1)
        # denominator: keeps the EUP-slot win, restores ~f32 accuracy for the
        # externally returned attention map.
        r = pl.reciprocal(denom, approx=True)
        r = r * (2.0 - denom * r)
        p = p * r
        att_acc = att_acc + p
        yh = jnp.einsum("bqk,bkd->bqd", p, vh,
                        preferred_element_type=jnp.float32)     # (Bb, T, D)
        y_attn = y_attn + jnp.dot(yh.reshape(M, D).astype(jnp.bfloat16),
                                  wp_ref[sl, :],
                                  preferred_element_type=jnp.float32)

    att_ref[...] = att_acc * (1.0 / H)                          # mean over heads

    x1 = x3.reshape(M, C) + y_attn                              # residual 1

    # ---- LayerNorm2 + MLP (bf16 matmuls, f32 elementwise) --------------------
    h_ln2 = _layernorm(x1) * g2_ref[...] + be2_ref[...]
    m = jnp.dot(h_ln2.astype(jnp.bfloat16), w1_ref[...],
                preferred_element_type=jnp.float32) + b1_ref[...]
    m = _gelu_exact(m)
    m = jnp.dot(m.astype(jnp.bfloat16), w2_ref[...],
                preferred_element_type=jnp.float32) + b2_ref[...]

    y_ref[...] = (x1 + m).reshape(Bb, T, C)                     # residual 2


# -------------------- block-size / VMEM budgeting helpers --------------------
def _divisors(n):
    return [d for d in range(1, n + 1) if n % d == 0]


def _vmem_estimate_bytes(block_b, T, C, Hd):
    M = block_b * T
    # bf16 weights, single-buffered (pl.Buffered(1))
    w = 2 * (C * 3 * C + C * C + C * Hd + Hd * C)
    # f32 biases / LN params, single-buffered
    b = 4 * (3 * C + C + 2 * C + Hd + C)
    # f32 per-block inputs/outputs, double-buffered by the pipeline
    io = 2 * 4 * (M * C + 2 * block_b * C + M * C + block_b * T * T)
    # rough live intermediates (qkv slab, h/x1/y_attn/m, attention tiles)
    act = 4 * (3 * M * C + 3 * M * C + M * Hd + 3 * block_b * T * T)
    return w + b + io + act + (2 << 20)


def _pick_block_b(batch, seq_len, cap_limit, C, Hd, target_rows=256):
    divs = _divisors(batch)
    # smallest divisor giving >= target_rows matmul rows (amortises the
    # ~0.35us per-grid-step overhead and fills the MXU M dimension)
    block_b = batch
    for d in divs:
        if d * seq_len >= target_rows:
            block_b = d
            break
    # keep grid_b >= 2 where possible so ("parallel",) batch blocks can shard
    # across v7x's two TensorCores
    if block_b == batch and batch > 1:
        block_b = max(d for d in divs if d < batch)
    # shrink until the VMEM estimate fits the per-chip budget
    while block_b > 1 and _vmem_estimate_bytes(block_b, seq_len, C, Hd) > cap_limit:
        block_b = max(d for d in divs if d < block_b)
    return block_b


def encoder_block_pallas(x, scale, shift, params, n_head, block_b=None):
    B, T, C = x.shape
    Hd = params["w1"].shape[1]       # mlp hidden = mlp_hidden_times * C

    # Per-chip VMEM capacity (v5e/v6e: 128 MiB, v7x: 64 MiB); keep headroom for
    # the double-buffered output blocks and compiler scratch.
    try:
        vmem_cap = pltpu.get_tpu_info().vmem_capacity_bytes
    except Exception:
        vmem_cap = 64 << 20
    cap_limit = max(32 << 20, vmem_cap - (12 << 20))

    if block_b is None:
        block_b = _pick_block_b(B, T, cap_limit, C, Hd)
    assert B % block_b == 0, "block_b must divide the batch"
    grid_b = B // block_b

    # Fuse Q/K/V weights into a single (C, 3C) projection (one MXU pass);
    # weights in bf16 for native MXU rate (f32 accumulation inside the kernel).
    wqkv = jnp.concatenate([params["wq"], params["wk"], params["wv"]],
                           axis=1).astype(jnp.bfloat16)
    bqkv = jnp.concatenate([params["bq"], params["bk"], params["bv"]], axis=1)
    wp = params["wp"].astype(jnp.bfloat16)
    w1 = params["w1"].astype(jnp.bfloat16)
    w2 = params["w2"].astype(jnp.bfloat16)

    # (B, 1, C) so per-batch-element scale/shift broadcast over tokens in-kernel.
    scale3 = scale.reshape(B, 1, C)
    shift3 = shift.reshape(B, 1, C)

    def replicated(shape):
        # Grid-invariant block (weights / biases / LN params): same block every
        # grid step -> single-buffer to halve resident weight VMEM and drop the
        # redundant per-step DMA descriptors.
        return pl.BlockSpec(shape, lambda b, _n=len(shape): (0,) * _n,
                            pipeline_mode=pl.Buffered(1))

    in_specs = [
        pl.BlockSpec((block_b, T, C), lambda b: (b, 0, 0)),   # x
        pl.BlockSpec((block_b, 1, C), lambda b: (b, 0, 0)),   # scale
        pl.BlockSpec((block_b, 1, C), lambda b: (b, 0, 0)),   # shift
        replicated((C, 3 * C)), replicated((1, 3 * C)),       # wqkv, bqkv
        replicated((C, C)), replicated((1, C)),               # wproj, bproj
        replicated((1, C)), replicated((1, C)),               # ln2 gamma, beta
        replicated((C, Hd)), replicated((1, Hd)),             # mlp w1, b1
        replicated((Hd, C)), replicated((1, C)),              # mlp w2, b2
    ]
    out_specs = [
        pl.BlockSpec((block_b, T, C), lambda b: (b, 0, 0)),   # y
        pl.BlockSpec((block_b, T, T), lambda b: (b, 0, 0)),   # mean attention
    ]
    out_shape = [
        jax.ShapeDtypeStruct((B, T, C), jnp.float32),
        jax.ShapeDtypeStruct((B, T, T), jnp.float32),
    ]

    vmem_est = _vmem_estimate_bytes(block_b, T, C, Hd)
    if vmem_est > (32 << 20):
        compiler_params = pltpu.CompilerParams(
            dimension_semantics=("parallel",),
            vmem_limit_bytes=int(min(vmem_est, cap_limit)))
    else:
        compiler_params = pltpu.CompilerParams(
            dimension_semantics=("parallel",))

    kernel = functools.partial(encoder_block_kernel, n_head)
    return pl.pallas_call(
        kernel,
        grid=(grid_b,),
        in_specs=in_specs,
        out_specs=out_specs,
        out_shape=out_shape,
        compiler_params=compiler_params,
    )(x, scale3, shift3, wqkv, bqkv,
      wp, params["bp"], params["g2"], params["be2"],
      w1, params["b1"], w2, params["b2"])


# -------------------- AdaLayerNorm scale/shift glue (plain JAX) --------------
def ada_scale_shift(timestep, w_ada, b_ada, n_embd, label_emb=None):
    half = n_embd // 2
    freqs = jnp.exp(jnp.arange(half, dtype=jnp.float32)
                    * (-math.log(10000.0) / (half - 1)))
    emb = timestep.astype(jnp.float32)[:, None] * freqs[None, :]
    emb = jnp.concatenate([jnp.sin(emb), jnp.cos(emb)], axis=-1)   # (B, C)
    if label_emb is not None:
        emb = emb + label_emb
    emb = jax.nn.silu(emb)
    emb = emb @ w_ada + b_ada                                      # (B, 2C)
    return emb[:, :n_embd], emb[:, n_embd:]                        # scale, shift


# -------------------- pure-JAX reference for verification --------------------
def reference(x, scale, shift, p, n_head):
    B, T, C = x.shape
    D = C // n_head
    h = _layernorm(x) * (1.0 + scale[:, None, :]) + shift[:, None, :]
    q = (h @ p["wq"] + p["bq"]).reshape(B, T, n_head, D).transpose(0, 2, 1, 3)
    k = (h @ p["wk"] + p["bk"]).reshape(B, T, n_head, D).transpose(0, 2, 1, 3)
    v = (h @ p["wv"] + p["bv"]).reshape(B, T, n_head, D).transpose(0, 2, 1, 3)
    att = jnp.einsum("bhtd,bhsd->bhts", q, k) / math.sqrt(D)
    att = jax.nn.softmax(att, axis=-1)
    y = jnp.einsum("bhts,bhsd->bhtd", att, v)
    y = y.transpose(0, 2, 1, 3).reshape(B, T, C)
    y = y @ p["wp"] + p["bp"]
    att_mean = att.mean(axis=1)
    x1 = x + y
    h2 = _layernorm(x1) * p["g2"] + p["be2"]
    m = _gelu_exact(h2 @ p["w1"] + p["b1"]) @ p["w2"] + p["b2"]
    return x1 + m, att_mean


if __name__ == "__main__":
    B, T, C, H, MLP = 2, 8, 32, 4, 4       # small shapes: n_embd=32, n_head=4
    Hd = MLP * C

    key = jax.random.PRNGKey(0)
    ks = jax.random.split(key, 16)

    def w(k, shape):
        return 0.02 * jax.random.normal(k, shape, dtype=jnp.float32)

    params = {
        "wq": w(ks[0], (C, C)), "bq": w(ks[8], (1, C)),
        "wk": w(ks[1], (C, C)), "bk": w(ks[9], (1, C)),
        "wv": w(ks[2], (C, C)), "bv": w(ks[10], (1, C)),
        "wp": w(ks[3], (C, C)), "bp": w(ks[11], (1, C)),
        "g2": 1.0 + w(ks[12], (1, C)), "be2": w(ks[13], (1, C)),
        "w1": w(ks[4], (C, Hd)), "b1": w(ks[14], (1, Hd)),
        "w2": w(ks[5], (Hd, C)), "b2": w(ks[15], (1, C)),
    }
    w_ada = w(ks[6], (C, 2 * C))
    b_ada = 0.02 * jax.random.normal(ks[7], (2 * C,), dtype=jnp.float32)

    x = jax.random.normal(ks[7], (B, T, C), dtype=jnp.float32)
    timestep = jnp.array([3, 7], dtype=jnp.int32)

    scale, shift = ada_scale_shift(timestep, w_ada, b_ada, C)

    y, att = encoder_block_pallas(x, scale, shift, params, H)
    jax.block_until_ready((y, att))

    y_exp, att_exp = reference(x, scale, shift, params, H)
    # Tolerance covers bf16-weight/activation matmuls (the softmax reciprocal
    # is Newton-refined back to ~f32 accuracy, so att error is also bf16-bound).
    assert jnp.allclose(y, y_exp, atol=5e-3, rtol=5e-3), "output mismatch"
    assert jnp.allclose(att, att_exp, atol=5e-3, rtol=5e-3), "attention mismatch"

    print("KERNEL_OK")
</pallas_src>

<mosaic_0001>
module attributes {stable_mosaic.version = 11 : i64} {
  func.func @encoder_block_kernel(%arg0: i32, %arg1: memref<1x8x32xf32, #tpu.memory_space<vmem>>, %arg2: memref<1x1x32xf32, #tpu.memory_space<vmem>>, %arg3: memref<1x1x32xf32, #tpu.memory_space<vmem>>, %arg4: memref<32x96xbf16, #tpu.memory_space<vmem>>, %arg5: memref<1x96xf32, #tpu.memory_space<vmem>>, %arg6: memref<32x32xbf16, #tpu.memory_space<vmem>>, %arg7: memref<1x32xf32, #tpu.memory_space<vmem>>, %arg8: memref<1x32xf32, #tpu.memory_space<vmem>>, %arg9: memref<1x32xf32, #tpu.memory_space<vmem>>, %arg10: memref<32x128xbf16, #tpu.memory_space<vmem>>, %arg11: memref<1x128xf32, #tpu.memory_space<vmem>>, %arg12: memref<128x32xbf16, #tpu.memory_space<vmem>>, %arg13: memref<1x32xf32, #tpu.memory_space<vmem>>, %arg14: memref<1x8x32xf32, #tpu.memory_space<vmem>>, %arg15: memref<1x8x8xf32, #tpu.memory_space<vmem>>) attributes {dimension_semantics = [#tpu.dimension_semantics<parallel>], iteration_bounds = array<i64: 2>, scalar_prefetch = 0 : i64, scratch_operands = 0 : i64, tpu.core_type = #tpu.core_type<tc>, window_params = [{transform_indices = @transform_0, window_bounds = array<i64: 1, 8, 32>}, {transform_indices = @transform_1, window_bounds = array<i64: 1, 1, 32>}, {transform_indices = @transform_2, window_bounds = array<i64: 1, 1, 32>}, {pipeline_mode = #tpu.pipeline_mode<synchronous>, transform_indices = @transform_3, window_bounds = array<i64: 32, 96>}, {pipeline_mode = #tpu.pipeline_mode<synchronous>, transform_indices = @transform_4, window_bounds = array<i64: 1, 96>}, {pipeline_mode = #tpu.pipeline_mode<synchronous>, transform_indices = @transform_5, window_bounds = array<i64: 32, 32>}, {pipeline_mode = #tpu.pipeline_mode<synchronous>, transform_indices = @transform_6, window_bounds = array<i64: 1, 32>}, {pipeline_mode = #tpu.pipeline_mode<synchronous>, transform_indices = @transform_7, window_bounds = array<i64: 1, 32>}, {pipeline_mode = #tpu.pipeline_mode<synchronous>, transform_indices = @transform_8, window_bounds = array<i64: 1, 32>}, {pipeline_mode = #tpu.pipeline_mode<synchronous>, transform_indices = @transform_9, window_bounds = array<i64: 32, 128>}, {pipeline_mode = #tpu.pipeline_mode<synchronous>, transform_indices = @transform_10, window_bounds = array<i64: 1, 128>}, {pipeline_mode = #tpu.pipeline_mode<synchronous>, transform_indices = @transform_11, window_bounds = array<i64: 128, 32>}, {pipeline_mode = #tpu.pipeline_mode<synchronous>, transform_indices = @transform_12, window_bounds = array<i64: 1, 32>}, {transform_indices = @transform_13, window_bounds = array<i64: 1, 8, 32>}, {transform_indices = @transform_14, window_bounds = array<i64: 1, 8, 8>}]} {
    %c0 = arith.constant 0 : index
    %c0_0 = arith.constant 0 : index
    %c0_1 = arith.constant 0 : index
    %0 = vector.load %arg1[%c0, %c0_0, %c0_1] : memref<1x8x32xf32, #tpu.memory_space<vmem>>, vector<1x8x32xf32>
    %cst = arith.constant dense<0.000000e+00> : vector<1x8xf32>
    %1 = vector.multi_reduction <add>, %0, %cst [2] : vector<1x8x32xf32> to vector<1x8xf32>
    %2 = vector.shape_cast %1 : vector<1x8xf32> to vector<1x8x1xf32>
    %cst_2 = arith.constant 3.200000e+01 : f32
    %3 = vector.broadcast %cst_2 : f32 to vector<1x8x1xf32>
    %4 = arith.divf %2, %3 : vector<1x8x1xf32>
    %5 = vector.broadcast %4 : vector<1x8x1xf32> to vector<1x8x32xf32>
    %6 = arith.subf %0, %5 : vector<1x8x32xf32>
    %7 = arith.mulf %6, %6 : vector<1x8x32xf32>
    %cst_3 = arith.constant dense<0.000000e+00> : vector<1x8xf32>
    %8 = vector.multi_reduction <add>, %7, %cst_3 [2] : vector<1x8x32xf32> to vector<1x8xf32>
    %9 = vector.shape_cast %8 : vector<1x8xf32> to vector<1x8x1xf32>
    %cst_4 = arith.constant 3.200000e+01 : f32
    %10 = vector.broadcast %cst_4 : f32 to vector<1x8x1xf32>
    %11 = arith.divf %9, %10 : vector<1x8x1xf32>
    %12 = vector.broadcast %4 : vector<1x8x1xf32> to vector<1x8x32xf32>
    %13 = arith.subf %0, %12 : vector<1x8x32xf32>
    %cst_5 = arith.constant 9.99999974E-6 : f32
    %14 = vector.broadcast %cst_5 : f32 to vector<1x8x1xf32>
    %15 = arith.addf %11, %14 : vector<1x8x1xf32>
    %16 = math.rsqrt %15 : vector<1x8x1xf32>
    %17 = vector.broadcast %16 : vector<1x8x1xf32> to vector<1x8x32xf32>
    %18 = arith.mulf %13, %17 : vector<1x8x32xf32>
    %c0_6 = arith.constant 0 : index
    %c0_7 = arith.constant 0 : index
    %c0_8 = arith.constant 0 : index
    %19 = vector.load %arg2[%c0_6, %c0_7, %c0_8] : memref<1x1x32xf32, #tpu.memory_space<vmem>>, vector<1x1x32xf32>
    %cst_9 = arith.constant 1.000000e+00 : f32
    %20 = vector.broadcast %cst_9 : f32 to vector<1x1x32xf32>
    %21 = arith.addf %20, %19 : vector<1x1x32xf32>
    %22 = vector.broadcast %21 : vector<1x1x32xf32> to vector<1x8x32xf32>
    %23 = arith.mulf %18, %22 : vector<1x8x32xf32>
    %c0_10 = arith.constant 0 : index
    %c0_11 = arith.constant 0 : index
    %c0_12 = arith.constant 0 : index
    %24 = vector.load %arg3[%c0_10, %c0_11, %c0_12] : memref<1x1x32xf32, #tpu.memory_space<vmem>>, vector<1x1x32xf32>
    %25 = vector.broadcast %24 : vector<1x1x32xf32> to vector<1x8x32xf32>
    %26 = arith.addf %23, %25 : vector<1x8x32xf32>
    %27 = vector.shape_cast %26 : vector<1x8x32xf32> to vector<8x32xf32>
    %28 = arith.truncf %27 : vector<8x32xf32> to vector<8x32xbf16>
    %c0_13 = arith.constant 0 : index
    %c0_14 = arith.constant 0 : index
    %29 = vector.load %arg4[%c0_13, %c0_14] : memref<32x96xbf16, #tpu.memory_space<vmem>>, vector<32x96xbf16>
    %cst_15 = arith.constant dense<0.000000e+00> : vector<8x96xf32>
    %30 = tpu.matmul %28, %29, %cst_15 {dimension_numbers = #tpu.dot_dimension_numbers<[1], [0], [0], [1], [0, 0, 1, 1], [], []>} : vector<8x32xbf16>, vector<32x96xbf16>, vector<8x96xf32> -> vector<8x96xf32>
    %c0_16 = arith.constant 0 : index
    %c0_17 = arith.constant 0 : index
    %31 = vector.load %arg5[%c0_16, %c0_17] : memref<1x96xf32, #tpu.memory_space<vmem>>, vector<1x96xf32>
    %32 = vector.broadcast %31 : vector<1x96xf32> to vector<8x96xf32>
    %33 = arith.addf %30, %32 : vector<8x96xf32>
    %34 = vector.extract_strided_slice %33 {offsets = [0, 0], sizes = [8, 32], strides = [1, 1]} : vector<8x96xf32> to vector<8x32xf32>
    %35 = vector.shape_cast %34 : vector<8x32xf32> to vector<1x8x32xf32>
    %36 = vector.extract_strided_slice %33 {offsets = [0, 32], sizes = [8, 32], strides = [1, 1]} : vector<8x96xf32> to vector<8x32xf32>
    %37 = vector.shape_cast %36 : vector<8x32xf32> to vector<1x8x32xf32>
    %38 = vector.extract_strided_slice %33 {offsets = [0, 64], sizes = [8, 32], strides = [1, 1]} : vector<8x96xf32> to vector<8x32xf32>
    %39 = vector.shape_cast %38 : vector<8x32xf32> to vector<1x8x32xf32>
    %cst_18 = arith.constant 0.000000e+00 : f32
    %40 = vector.broadcast %cst_18 : f32 to vector<1x8x8xf32>
    %cst_19 = arith.constant 0.000000e+00 : f32
    %41 = vector.broadcast %cst_19 : f32 to vector<8x32xf32>
    %c0_20 = arith.constant 0 : index
    %c0_21 = arith.constant 0 : index
    %42 = vector.load %arg7[%c0_20, %c0_21] : memref<1x32xf32, #tpu.memory_space<vmem>>, vector<1x32xf32>
    %43 = vector.broadcast %42 : vector<1x32xf32> to vector<8x32xf32>
    %44 = arith.addf %41, %43 : vector<8x32xf32>
    %45 = vector.extract_strided_slice %35 {offsets = [0, 0, 0], sizes = [1, 8, 8], strides = [1, 1, 1]} : vector<1x8x32xf32> to vector<1x8x8xf32>
    %46 = vector.extract_strided_slice %37 {offsets = [0, 0, 0], sizes = [1, 8, 8], strides = [1, 1, 1]} : vector<1x8x32xf32> to vector<1x8x8xf32>
    %47 = vector.extract_strided_slice %39 {offsets = [0, 0, 0], sizes = [1, 8, 8], strides = [1, 1, 1]} : vector<1x8x32xf32> to vector<1x8x8xf32>
    "tpu.trace_start"() <{level = 10 : i32, message = "bqd,bkd->bqk"}> : () -> ()
    %cst_22 = arith.constant dense<0.000000e+00> : vector<1x8x8xf32>
    %48 = tpu.matmul %45, %46, %cst_22 {dimension_numbers = #tpu.dot_dimension_numbers<[2], [2], [1], [1], [0, 0, 0, 1, 1, 1], [0], [0]>} : vector<1x8x8xf32>, vector<1x8x8xf32>, vector<1x8x8xf32> -> vector<1x8x8xf32>
    "tpu.trace_stop"() : () -> ()
    %cst_23 = arith.constant 0.353553385 : f32
    %49 = vector.broadcast %cst_23 : f32 to vector<1x8x8xf32>
    %50 = arith.mulf %48, %49 : vector<1x8x8xf32>
    %cst_24 = arith.constant dense<0xFF800000> : vector<1x8xf32>
    %51 = vector.multi_reduction <maximumf>, %50, %cst_24 [2] : vector<1x8x8xf32> to vector<1x8xf32>
    %52 = vector.shape_cast %51 : vector<1x8xf32> to vector<1x8x1xf32>
    %53 = vector.broadcast %52 : vector<1x8x1xf32> to vector<1x8x8xf32>
    %54 = arith.subf %50, %53 : vector<1x8x8xf32>
    %55 = math.exp %54 : vector<1x8x8xf32>
    %cst_25 = arith.constant dense<0.000000e+00> : vector<1x8xf32>
    %56 = vector.multi_reduction <add>, %55, %cst_25 [2] : vector<1x8x8xf32> to vector<1x8xf32>
    %57 = vector.shape_cast %56 : vector<1x8xf32> to vector<1x8x1xf32>
    %58 = tpu.reciprocal %57 {approx = true} : vector<1x8x1xf32> -> vector<1x8x1xf32>
    %59 = arith.mulf %57, %58 : vector<1x8x1xf32>
    %cst_26 = arith.constant 2.000000e+00 : f32
    %60 = vector.broadcast %cst_26 : f32 to vector<1x8x1xf32>
    %61 = arith.subf %60, %59 : vector<1x8x1xf32>
    %62 = arith.mulf %58, %61 : vector<1x8x1xf32>
    %63 = vector.broadcast %62 : vector<1x8x1xf32> to vector<1x8x8xf32>
    %64 = arith.mulf %55, %63 : vector<1x8x8xf32>
    %65 = arith.addf %40, %64 : vector<1x8x8xf32>
    "tpu.trace_start"() <{level = 10 : i32, message = "bqk,bkd->bqd"}> : () -> ()
    %cst_27 = arith.constant dense<0.000000e+00> : vector<1x8x8xf32>
    %66 = tpu.matmul %64, %47, %cst_27 {dimension_numbers = #tpu.dot_dimension_numbers<[2], [1], [1], [2], [0, 0, 0, 1, 1, 2], [0], [0]>} : vector<1x8x8xf32>, vector<1x8x8xf32>, vector<1x8x8xf32> -> vector<1x8x8xf32>
    "tpu.trace_stop"() : () -> ()
    %67 = vector.shape_cast %66 : vector<1x8x8xf32> to vector<8x8xf32>
    %68 = arith.truncf %67 : vector<8x8xf32> to vector<8x8xbf16>
    %c0_28 = arith.constant 0 : index
    %c0_29 = arith.constant 0 : index
    %69 = vector.load %arg6[%c0_28, %c0_29] : memref<32x32xbf16, #tpu.memory_space<vmem>>, vector<8x32xbf16>
    %cst_30 = arith.constant dense<0.000000e+00> : vector<8x32xf32>
    %70 = tpu.matmul %68, %69, %cst_30 {dimension_numbers = #tpu.dot_dimension_numbers<[1], [0], [0], [1], [0, 0, 1, 1], [], []>} : vector<8x8xbf16>, vector<8x32xbf16>, vector<8x32xf32> -> vector<8x32xf32>
    %71 = arith.addf %44, %70 : vector<8x32xf32>
    %72 = vector.extract_strided_slice %35 {offsets = [0, 0, 8], sizes = [1, 8, 8], strides = [1, 1, 1]} : vector<1x8x32xf32> to vector<1x8x8xf32>
    %73 = vector.extract_strided_slice %37 {offsets = [0, 0, 8], sizes = [1, 8, 8], strides = [1, 1, 1]} : vector<1x8x32xf32> to vector<1x8x8xf32>
    %74 = vector.extract_strided_slice %39 {offsets = [0, 0, 8], sizes = [1, 8, 8], strides = [1, 1, 1]} : vector<1x8x32xf32> to vector<1x8x8xf32>
    "tpu.trace_start"() <{level = 10 : i32, message = "bqd,bkd->bqk"}> : () -> ()
    %cst_31 = arith.constant dense<0.000000e+00> : vector<1x8x8xf32>
    %75 = tpu.matmul %72, %73, %cst_31 {dimension_numbers = #tpu.dot_dimension_numbers<[2], [2], [1], [1], [0, 0, 0, 1, 1, 1], [0], [0]>} : vector<1x8x8xf32>, vector<1x8x8xf32>, vector<1x8x8xf32> -> vector<1x8x8xf32>
    "tpu.trace_stop"() : () -> ()
    %cst_32 = arith.constant 0.353553385 : f32
    %76 = vector.broadcast %cst_32 : f32 to vector<1x8x8xf32>
    %77 = arith.mulf %75, %76 : vector<1x8x8xf32>
    %cst_33 = arith.constant dense<0xFF800000> : vector<1x8xf32>
    %78 = vector.multi_reduction <maximumf>, %77, %cst_33 [2] : vector<1x8x8xf32> to vector<1x8xf32>
    %79 = vector.shape_cast %78 : vector<1x8xf32> to vector<1x8x1xf32>
    %80 = vector.broadcast %79 : vector<1x8x1xf32> to vector<1x8x8xf32>
    %81 = arith.subf %77, %80 : vector<1x8x8xf32>
    %82 = math.exp %81 : vector<1x8x8xf32>
    %cst_34 = arith.constant dense<0.000000e+00> : vector<1x8xf32>
    %83 = vector.multi_reduction <add>, %82, %cst_34 [2] : vector<1x8x8xf32> to vector<1x8xf32>
    %84 = vector.shape_cast %83 : vector<1x8xf32> to vector<1x8x1xf32>
    %85 = tpu.reciprocal %84 {approx = true} : vector<1x8x1xf32> -> vector<1x8x1xf32>
    %86 = arith.mulf %84, %85 : vector<1x8x1xf32>
    %cst_35 = arith.constant 2.000000e+00 : f32
    %87 = vector.broadcast %cst_35 : f32 to vector<1x8x1xf32>
    %88 = arith.subf %87, %86 : vector<1x8x1xf32>
    %89 = arith.mulf %85, %88 : vector<1x8x1xf32>
    %90 = vector.broadcast %89 : vector<1x8x1xf32> to vector<1x8x8xf32>
    %91 = arith.mulf %82, %90 : vector<1x8x8xf32>
    %92 = arith.addf %65, %91 : vector<1x8x8xf32>
    "tpu.trace_start"() <{level = 10 : i32, message = "bqk,bkd->bqd"}> : () -> ()
    %cst_36 = arith.constant dense<0.000000e+00> : vector<1x8x8xf32>
    %93 = tpu.matmul %91, %74, %cst_36 {dimension_numbers = #tpu.dot_dimension_numbers<[2], [1], [1], [2], [0, 0, 0, 1, 1, 2], [0], [0]>} : vector<1x8x8xf32>, vector<1x8x8xf32>, vector<1x8x8xf32> -> vector<1x8x8xf32>
    "tpu.trace_stop"() : () -> ()
    %94 = vector.shape_cast %93 : vector<1x8x8xf32> to vector<8x8xf32>
    %95 = arith.truncf %94 : vector<8x8xf32> to vector<8x8xbf16>
    %c8 = arith.constant 8 : index
    %c0_37 = arith.constant 0 : index
    %96 = vector.load %arg6[%c8, %c0_37] : memref<32x32xbf16, #tpu.memory_space<vmem>>, vector<8x32xbf16>
    %cst_38 = arith.constant dense<0.000000e+00> : vector<8x32xf32>
    %97 = tpu.matmul %95, %96, %cst_38 {dimension_numbers = #tpu.dot_dimension_numbers<[1], [0], [0], [1], [0, 0, 1, 1], [], []>} : vector<8x8xbf16>, vector<8x32xbf16>, vector<8x32xf32> -> vector<8x32xf32>
    %98 = arith.addf %71, %97 : vector<8x32xf32>
    %99 = vector.extract_strided_slice %35 {offsets = [0, 0, 16], sizes = [1, 8, 8], strides = [1, 1, 1]} : vector<1x8x32xf32> to vector<1x8x8xf32>
    %100 = vector.extract_strided_slice %37 {offsets = [0, 0, 16], sizes = [1, 8, 8], strides = [1, 1, 1]} : vector<1x8x32xf32> to vector<1x8x8xf32>
    %101 = vector.extract_strided_slice %39 {offsets = [0, 0, 16], sizes = [1, 8, 8], strides = [1, 1, 1]} : vector<1x8x32xf32> to vector<1x8x8xf32>
    "tpu.trace_start"() <{level = 10 : i32, message = "bqd,bkd->bqk"}> : () -> ()
    %cst_39 = arith.constant dense<0.000000e+00> : vector<1x8x8xf32>
    %102 = tpu.matmul %99, %100, %cst_39 {dimension_numbers = #tpu.dot_dimension_numbers<[2], [2], [1], [1], [0, 0, 0, 1, 1, 1], [0], [0]>} : vector<1x8x8xf32>, vector<1x8x8xf32>, vector<1x8x8xf32> -> vector<1x8x8xf32>
    "tpu.trace_stop"() : () -> ()
    %cst_40 = arith.constant 0.353553385 : f32
    %103 = vector.broadcast %cst_40 : f32 to vector<1x8x8xf32>
    %104 = arith.mulf %102, %103 : vector<1x8x8xf32>
    %cst_41 = arith.constant dense<0xFF800000> : vector<1x8xf32>
    %105 = vector.multi_reduction <maximumf>, %104, %cst_41 [2] : vector<1x8x8xf32> to vector<1x8xf32>
    %106 = vector.shape_cast %105 : vector<1x8xf32> to vector<1x8x1xf32>
    %107 = vector.broadcast %106 : vector<1x8x1xf32> to vector<1x8x8xf32>
    %108 = arith.subf %104, %107 : vector<1x8x8xf32>
    %109 = math.exp %108 : vector<1x8x8xf32>
    %cst_42 = arith.constant dense<0.000000e+00> : vector<1x8xf32>
    %110 = vector.multi_reduction <add>, %109, %cst_42 [2] : vector<1x8x8xf32> to vector<1x8xf32>
    %111 = vector.shape_cast %110 : vector<1x8xf32> to vector<1x8x1xf32>
    %112 = tpu.reciprocal %111 {approx = true} : vector<1x8x1xf32> -> vector<1x8x1xf32>
    %113 = arith.mulf %111, %112 : vector<1x8x1xf32>
    %cst_43 = arith.constant 2.000000e+00 : f32
    %114 = vector.broadcast %cst_43 : f32 to vector<1x8x1xf32>
    %115 = arith.subf %114, %113 : vector<1x8x1xf32>
    %116 = arith.mulf %112, %115 : vector<1x8x1xf32>
    %117 = vector.broadcast %116 : vector<1x8x1xf32> to vector<1x8x8xf32>
    %118 = arith.mulf %109, %117 : vector<1x8x8xf32>
    %119 = arith.addf %92, %118 : vector<1x8x8xf32>
    "tpu.trace_start"() <{level = 10 : i32, message = "bqk,bkd->bqd"}> : () -> ()
    %cst_44 = arith.constant dense<0.000000e+00> : vector<1x8x8xf32>
    %120 = tpu.matmul %118, %101, %cst_44 {dimension_numbers = #tpu.dot_dimension_numbers<[2], [1], [1], [2], [0, 0, 0, 1, 1, 2], [0], [0]>} : vector<1x8x8xf32>, vector<1x8x8xf32>, vector<1x8x8xf32> -> vector<1x8x8xf32>
    "tpu.trace_stop"() : () -> ()
    %121 = vector.shape_cast %120 : vector<1x8x8xf32> to vector<8x8xf32>
    %122 = arith.truncf %121 : vector<8x8xf32> to vector<8x8xbf16>
    %c16 = arith.constant 16 : index
    %c0_45 = arith.constant 0 : index
    %123 = vector.load %arg6[%c16, %c0_45] : memref<32x32xbf16, #tpu.memory_space<vmem>>, vector<8x32xbf16>
    %cst_46 = arith.constant dense<0.000000e+00> : vector<8x32xf32>
    %124 = tpu.matmul %122, %123, %cst_46 {dimension_numbers = #tpu.dot_dimension_numbers<[1], [0], [0], [1], [0, 0, 1, 1], [], []>} : vector<8x8xbf16>, vector<8x32xbf16>, vector<8x32xf32> -> vector<8x32xf32>
    %125 = arith.addf %98, %124 : vector<8x32xf32>
    %126 = vector.extract_strided_slice %35 {offsets = [0, 0, 24], sizes = [1, 8, 8], strides = [1, 1, 1]} : vector<1x8x32xf32> to vector<1x8x8xf32>
    %127 = vector.extract_strided_slice %37 {offsets = [0, 0, 24], sizes = [1, 8, 8], strides = [1, 1, 1]} : vector<1x8x32xf32> to vector<1x8x8xf32>
    %128 = vector.extract_strided_slice %39 {offsets = [0, 0, 24], sizes = [1, 8, 8], strides = [1, 1, 1]} : vector<1x8x32xf32> to vector<1x8x8xf32>
    "tpu.trace_start"() <{level = 10 : i32, message = "bqd,bkd->bqk"}> : () -> ()
    %cst_47 = arith.constant dense<0.000000e+00> : vector<1x8x8xf32>
    %129 = tpu.matmul %126, %127, %cst_47 {dimension_numbers = #tpu.dot_dimension_numbers<[2], [2], [1], [1], [0, 0, 0, 1, 1, 1], [0], [0]>} : vector<1x8x8xf32>, vector<1x8x8xf32>, vector<1x8x8xf32> -> vector<1x8x8xf32>
    "tpu.trace_stop"() : () -> ()
    %cst_48 = arith.constant 0.353553385 : f32
    %130 = vector.broadcast %cst_48 : f32 to vector<1x8x8xf32>
    %131 = arith.mulf %129, %130 : vector<1x8x8xf32>
    %cst_49 = arith.constant dense<0xFF800000> : vector<1x8xf32>
    %132 = vector.multi_reduction <maximumf>, %131, %cst_49 [2] : vector<1x8x8xf32> to vector<1x8xf32>
    %133 = vector.shape_cast %132 : vector<1x8xf32> to vector<1x8x1xf32>
    %134 = vector.broadcast %133 : vector<1x8x1xf32> to vector<1x8x8xf32>
    %135 = arith.subf %131, %134 : vector<1x8x8xf32>
    %136 = math.exp %135 : vector<1x8x8xf32>
    %cst_50 = arith.constant dense<0.000000e+00> : vector<1x8xf32>
    %137 = vector.multi_reduction <add>, %136, %cst_50 [2] : vector<1x8x8xf32> to vector<1x8xf32>
    %138 = vector.shape_cast %137 : vector<1x8xf32> to vector<1x8x1xf32>
    %139 = tpu.reciprocal %138 {approx = true} : vector<1x8x1xf32> -> vector<1x8x1xf32>
    %140 = arith.mulf %138, %139 : vector<1x8x1xf32>
    %cst_51 = arith.constant 2.000000e+00 : f32
    %141 = vector.broadcast %cst_51 : f32 to vector<1x8x1xf32>
    %142 = arith.subf %141, %140 : vector<1x8x1xf32>
    %143 = arith.mulf %139, %142 : vector<1x8x1xf32>
    %144 = vector.broadcast %143 : vector<1x8x1xf32> to vector<1x8x8xf32>
    %145 = arith.mulf %136, %144 : vector<1x8x8xf32>
    %146 = arith.addf %119, %145 : vector<1x8x8xf32>
    "tpu.trace_start"() <{level = 10 : i32, message = "bqk,bkd->bqd"}> : () -> ()
    %cst_52 = arith.constant dense<0.000000e+00> : vector<1x8x8xf32>
    %147 = tpu.matmul %145, %128, %cst_52 {dimension_numbers = #tpu.dot_dimension_numbers<[2], [1], [1], [2], [0, 0, 0, 1, 1, 2], [0], [0]>} : vector<1x8x8xf32>, vector<1x8x8xf32>, vector<1x8x8xf32> -> vector<1x8x8xf32>
    "tpu.trace_stop"() : () -> ()
    %148 = vector.shape_cast %147 : vector<1x8x8xf32> to vector<8x8xf32>
    %149 = arith.truncf %148 : vector<8x8xf32> to vector<8x8xbf16>
    %c24 = arith.constant 24 : index
    %c0_53 = arith.constant 0 : index
    %150 = vector.load %arg6[%c24, %c0_53] : memref<32x32xbf16, #tpu.memory_space<vmem>>, vector<8x32xbf16>
    %cst_54 = arith.constant dense<0.000000e+00> : vector<8x32xf32>
    %151 = tpu.matmul %149, %150, %cst_54 {dimension_numbers = #tpu.dot_dimension_numbers<[1], [0], [0], [1], [0, 0, 1, 1], [], []>} : vector<8x8xbf16>, vector<8x32xbf16>, vector<8x32xf32> -> vector<8x32xf32>
    %152 = arith.addf %125, %151 : vector<8x32xf32>
    %cst_55 = arith.constant 2.500000e-01 : f32
    %153 = vector.broadcast %cst_55 : f32 to vector<1x8x8xf32>
    %154 = arith.mulf %146, %153 : vector<1x8x8xf32>
    %c0_56 = arith.constant 0 : index
    %c0_57 = arith.constant 0 : index
    %c0_58 = arith.constant 0 : index
    %155 = vector.load %arg15[%c0_56, %c0_57, %c0_58] : memref<1x8x8xf32, #tpu.memory_space<vmem>>, vector<1x8x8xf32>
    tpu.vector_store %arg15[%c0_56, %c0_57, %c0_58], %154 {strides = array<i32>} : memref<1x8x8xf32, #tpu.memory_space<vmem>>, vector<1x8x8xf32>,
    %156 = vector.shape_cast %0 : vector<1x8x32xf32> to vector<8x32xf32>
    %157 = arith.addf %156, %152 : vector<8x32xf32>
    %cst_59 = arith.constant dense<0.000000e+00> : vector<8xf32>
    %158 = vector.multi_reduction <add>, %157, %cst_59 [1] : vector<8x32xf32> to vector<8xf32>
    %159 = vector.shape_cast %158 : vector<8xf32> to vector<8x1xf32>
    %cst_60 = arith.constant 3.200000e+01 : f32
    %160 = vector.broadcast %cst_60 : f32 to vector<8x1xf32>
    %161 = arith.divf %159, %160 : vector<8x1xf32>
    %162 = vector.broadcast %161 : vector<8x1xf32> to vector<8x32xf32>
    %163 = arith.subf %157, %162 : vector<8x32xf32>
    %164 = arith.mulf %163, %163 : vector<8x32xf32>
    %cst_61 = arith.constant dense<0.000000e+00> : vector<8xf32>
    %165 = vector.multi_reduction <add>, %164, %cst_61 [1] : vector<8x32xf32> to vector<8xf32>
    %166 = vector.shape_cast %165 : vector<8xf32> to vector<8x1xf32>
    %cst_62 = arith.constant 3.200000e+01 : f32
    %167 = vector.broadcast %cst_62 : f32 to vector<8x1xf32>
    %168 = arith.divf %166, %167 : vector<8x1xf32>
    %169 = vector.broadcast %161 : vector<8x1xf32> to vector<8x32xf32>
    %170 = arith.subf %157, %169 : vector<8x32xf32>
    %cst_63 = arith.constant 9.99999974E-6 : f32
    %171 = vector.broadcast %cst_63 : f32 to vector<8x1xf32>
    %172 = arith.addf %168, %171 : vector<8x1xf32>
    %173 = math.rsqrt %172 : vector<8x1xf32>
    %174 = vector.broadcast %173 : vector<8x1xf32> to vector<8x32xf32>
    %175 = arith.mulf %170, %174 : vector<8x32xf32>
    %c0_64 = arith.constant 0 : index
    %c0_65 = arith.constant 0 : index
    %176 = vector.load %arg8[%c0_64, %c0_65] : memref<1x32xf32, #tpu.memory_space<vmem>>, vector<1x32xf32>
    %177 = vector.broadcast %176 : vector<1x32xf32> to vector<8x32xf32>
    %178 = arith.mulf %175, %177 : vector<8x32xf32>
    %c0_66 = arith.constant 0 : index
    %c0_67 = arith.constant 0 : index
    %179 = vector.load %arg9[%c0_66, %c0_67] : memref<1x32xf32, #tpu.memory_space<vmem>>, vector<1x32xf32>
    %180 = vector.broadcast %179 : vector<1x32xf32> to vector<8x32xf32>
    %181 = arith.addf %178, %180 : vector<8x32xf32>
    %182 = arith.truncf %181 : vector<8x32xf32> to vector<8x32xbf16>
    %c0_68 = arith.constant 0 : index
    %c0_69 = arith.constant 0 : index
    %183 = vector.load %arg10[%c0_68, %c0_69] : memref<32x128xbf16, #tpu.memory_space<vmem>>, vector<32x128xbf16>
    %cst_70 = arith.constant dense<0.000000e+00> : vector<8x128xf32>
    %184 = tpu.matmul %182, %183, %cst_70 {dimension_numbers = #tpu.dot_dimension_numbers<[1], [0], [0], [1], [0, 0, 1, 1], [], []>} : vector<8x32xbf16>, vector<32x128xbf16>, vector<8x128xf32> -> vector<8x128xf32>
    %c0_71 = arith.constant 0 : index
    %c0_72 = arith.constant 0 : index
    %185 = vector.load %arg11[%c0_71, %c0_72] : memref<1x128xf32, #tpu.memory_space<vmem>>, vector<1x128xf32>
    %186 = vector.broadcast %185 : vector<1x128xf32> to vector<8x128xf32>
    %187 = arith.addf %184, %186 : vector<8x128xf32>
    %cst_73 = arith.constant 5.000000e-01 : f32
    %188 = vector.broadcast %cst_73 : f32 to vector<8x128xf32>
    %189 = arith.mulf %188, %187 : vector<8x128xf32>
    %cst_74 = arith.constant 0.707106769 : f32
    %190 = vector.broadcast %cst_74 : f32 to vector<8x128xf32>
    %191 = arith.mulf %187, %190 : vector<8x128xf32>
    %192 = math.erf %191 : vector<8x128xf32>
    %cst_75 = arith.constant 1.000000e+00 : f32
    %193 = vector.broadcast %cst_75 : f32 to vector<8x128xf32>
    %194 = arith.addf %193, %192 : vector<8x128xf32>
    %195 = arith.mulf %189, %194 : vector<8x128xf32>
    %196 = arith.truncf %195 : vector<8x128xf32> to vector<8x128xbf16>
    %c0_76 = arith.constant 0 : index
    %c0_77 = arith.constant 0 : index
    %197 = vector.load %arg12[%c0_76, %c0_77] : memref<128x32xbf16, #tpu.memory_space<vmem>>, vector<128x32xbf16>
    %cst_78 = arith.constant dense<0.000000e+00> : vector<8x32xf32>
    %198 = tpu.matmul %196, %197, %cst_78 {dimension_numbers = #tpu.dot_dimension_numbers<[1], [0], [0], [1], [0, 0, 1, 1], [], []>} : vector<8x128xbf16>, vector<128x32xbf16>, vector<8x32xf32> -> vector<8x32xf32>
    %c0_79 = arith.constant 0 : index
    %c0_80 = arith.constant 0 : index
    %199 = vector.load %arg13[%c0_79, %c0_80] : memref<1x32xf32, #tpu.memory_space<vmem>>, vector<1x32xf32>
    %200 = vector.broadcast %199 : vector<1x32xf32> to vector<8x32xf32>
    %201 = arith.addf %198, %200 : vector<8x32xf32>
    %202 = arith.addf %157, %201 : vector<8x32xf32>
    %203 = vector.shape_cast %202 : vector<8x32xf32> to vector<1x8x32xf32>
    %c0_81 = arith.constant 0 : index
    %c0_82 = arith.constant 0 : index
    %c0_83 = arith.constant 0 : index
    %204 = vector.load %arg14[%c0_81, %c0_82, %c0_83] : memref<1x8x32xf32, #tpu.memory_space<vmem>>, vector<1x8x32xf32>
    tpu.vector_store %arg14[%c0_81, %c0_82, %c0_83], %203 {strides = array<i32>} : memref<1x8x32xf32, #tpu.memory_space<vmem>>, vector<1x8x32xf32>,
    return
  }
  func.func @transform_0(%arg0: i32) -> (i32, i32, i32) {
    %c0_i32 = arith.constant 0 : i32
    %c0_i32_0 = arith.constant 0 : i32
    %c0_i32_1 = arith.constant 0 : i32
    return %arg0, %c0_i32, %c0_i32_0 : i32, i32, i32
  }
  func.func @transform_1(%arg0: i32) -> (i32, i32, i32) {
    %c0_i32 = arith.constant 0 : i32
    %c0_i32_0 = arith.constant 0 : i32
    %c0_i32_1 = arith.constant 0 : i32
    return %arg0, %c0_i32, %c0_i32_0 : i32, i32, i32
  }
  func.func @transform_2(%arg0: i32) -> (i32, i32, i32) {
    %c0_i32 = arith.constant 0 : i32
    %c0_i32_0 = arith.constant 0 : i32
    %c0_i32_1 = arith.constant 0 : i32
    return %arg0, %c0_i32, %c0_i32_0 : i32, i32, i32
  }
  func.func @transform_3(%arg0: i32) -> (i32, i32) {
    %c0_i32 = arith.constant 0 : i32
    %c0_i32_0 = arith.constant 0 : i32
    %c0_i32_1 = arith.constant 0 : i32
    return %c0_i32, %c0_i32_0 : i32, i32
  }
  func.func @transform_4(%arg0: i32) -> (i32, i32) {
    %c0_i32 = arith.constant 0 : i32
    %c0_i32_0 = arith.constant 0 : i32
    %c0_i32_1 = arith.constant 0 : i32
    return %c0_i32, %c0_i32_0 : i32, i32
  }
  func.func @transform_5(%arg0: i32) -> (i32, i32) {
    %c0_i32 = arith.constant 0 : i32
    %c0_i32_0 = arith.constant 0 : i32
    %c0_i32_1 = arith.constant 0 : i32
    return %c0_i32, %c0_i32_0 : i32, i32
  }
  func.func @transform_6(%arg0: i32) -> (i32, i32) {
    %c0_i32 = arith.constant 0 : i32
    %c0_i32_0 = arith.constant 0 : i32
    %c0_i32_1 = arith.constant 0 : i32
    return %c0_i32, %c0_i32_0 : i32, i32
  }
  func.func @transform_7(%arg0: i32) -> (i32, i32) {
    %c0_i32 = arith.constant 0 : i32
    %c0_i32_0 = arith.constant 0 : i32
    %c0_i32_1 = arith.constant 0 : i32
    return %c0_i32, %c0_i32_0 : i32, i32
  }
  func.func @transform_8(%arg0: i32) -> (i32, i32) {
    %c0_i32 = arith.constant 0 : i32
    %c0_i32_0 = arith.constant 0 : i32
    %c0_i32_1 = arith.constant 0 : i32
    return %c0_i32, %c0_i32_0 : i32, i32
  }
  func.func @transform_9(%arg0: i32) -> (i32, i32) {
    %c0_i32 = arith.constant 0 : i32
    %c0_i32_0 = arith.constant 0 : i32
    %c0_i32_1 = arith.constant 0 : i32
    return %c0_i32, %c0_i32_0 : i32, i32
  }
  func.func @transform_10(%arg0: i32) -> (i32, i32) {
    %c0_i32 = arith.constant 0 : i32
    %c0_i32_0 = arith.constant 0 : i32
    %c0_i32_1 = arith.constant 0 : i32
    return %c0_i32, %c0_i32_0 : i32, i32
  }
  func.func @transform_11(%arg0: i32) -> (i32, i32) {
    %c0_i32 = arith.constant 0 : i32
    %c0_i32_0 = arith.constant 0 : i32
    %c0_i32_1 = arith.constant 0 : i32
    return %c0_i32, %c0_i32_0 : i32, i32
  }
  func.func @transform_12(%arg0: i32) -> (i32, i32) {
    %c0_i32 = arith.constant 0 : i32
    %c0_i32_0 = arith.constant 0 : i32
    %c0_i32_1 = arith.constant 0 : i32
    return %c0_i32, %c0_i32_0 : i32, i32
  }
  func.func @transform_13(%arg0: i32) -> (i32, i32, i32) {
    %c0_i32 = arith.constant 0 : i32
    %c0_i32_0 = arith.constant 0 : i32
    %c0_i32_1 = arith.constant 0 : i32
    return %arg0, %c0_i32, %c0_i32_0 : i32, i32, i32
  }
  func.func @transform_14(%arg0: i32) -> (i32, i32, i32) {
    %c0_i32 = arith.constant 0 : i32
    %c0_i32_0 = arith.constant 0 : i32
    %c0_i32_1 = arith.constant 0 : i32
    return %arg0, %c0_i32, %c0_i32_0 : i32, i32, i32
  }
}

</mosaic_0001>

<bundles_post_ra>
// kernel: tpu_custom_call.1
= control target key start
LH: loop header
LB: loop body
LE: loop exit
PB: predicated region body
PF: predicated region fallthrough
CT: control target
= control target key end

     0   :  { %s2638_s0 = inlined_call_operand.vmem [shape: f32[2,8,32], index: 0, kind: input, shape index: {}]   ;;  %s2639_s1 = inlined_call_operand.vmem [shape: f32[2,1,32], index: 1, kind: input, shape index: {}]   ;;  %s2640_s2 = inlined_call_operand.vmem [shape: f32[2,1,32], index: 2, kind: input, shape index: {}]   ;;  %s2641_s3 = inlined_call_operand.vmem [shape: bf16[32,96], index: 3, kind: input, shape index: {}]   ;;  %s2642_s4 = inlined_call_operand.vmem [shape: f32[1,96], index: 4, kind: input, shape index: {}]   ;;  %s2643_s5 = inlined_call_operand.vmem [shape: bf16[32,32], index: 5, kind: input, shape index: {}]   ;;  %s2644_s6 = inlined_call_operand.vmem [shape: f32[1,32], index: 6, kind: input, shape index: {}]   ;;  %s2645_s7 = inlined_call_operand.vmem [shape: f32[1,32], index: 7, kind: input, shape index: {}]   ;;  %s2646_s8 = inlined_call_operand.vmem [shape: f32[1,32], index: 8, kind: input, shape index: {}]   ;;  %s2647_s9 = inlined_call_operand.vmem [shape: bf16[32,128], index: 9, kind: input, shape index: {}]   ;;  %s2648_s10 = inlined_call_operand.vmem [shape: f32[1,128], index: 10, kind: input, shape index: {}]   ;;  %s2649_s11 = inlined_call_operand.vmem [shape: bf16[128,32], index: 11, kind: input, shape index: {}]   ;;  %s2650_s12 = inlined_call_operand.vmem [shape: f32[1,32], index: 12, kind: input, shape index: {}]   ;;  %s2651_s13 = inlined_call_operand.hbm [shape: f32[2,8,32], index: 13, kind: output, shape index: {0}]   ;;  %s2652_s14 = inlined_call_operand.hbm [shape: f32[2,8,8], index: 14, kind: output, shape index: {1}]  }
   0x1   :  { %2655 = sst [smem:[#allocation8_spill]] %s2638_s0 }
   0x2   :  { %2656 = sst [smem:[#allocation9_spill]] %s2639_s1 }
   0x3   :  { %2657 = sst [smem:[#allocation10_spill]] %s2640_s2 }
   0x4   :  { %2658 = sst [smem:[#allocation11_spill]] %s2641_s3 }
   0x5   :  { %2659 = sst [smem:[#allocation12_spill]] %s2642_s4 }
   0x6   :  { %2660 = sst [smem:[#allocation13_spill]] %s2643_s5 }
   0x7   :  { %2661 = sst [smem:[#allocation14_spill]] %s2644_s6 }
   0x8   :  { %20 = vsyncpa [#allocation3], 0 }
   0x9   :  { %22 = vsyncpa [#allocation3 + $0x1], 0 }
   0xa   :  { %23 = vsyncpa [#allocation5], 0 }
   0xb   :  { %25 = vsyncpa [#allocation5 + $0x1], 0  ;;  %s2309_s29 = smov 0   ;;  %s2311_s30 = smov 0  }
   0xc   :  { %s2313_s15 = smov 0   ;;  %s2315_s16 = smov 0  }
   0xd LB: > { %s2330_s17 = sadd.s32 4294967295, %s2217_s16   ;;  %s1847_s18 = sadd.s32 4294967294, %s2217_s16   ;;  %s2217_s16 = sphi %s2315_s16, %s2676_s16   ;;  %s2213_s15 = sphi %s2313_s15, %s2675_s15   ;;  %s2209_s30 = sphi %s2311_s30, %s2674_s30   ;;  %s2205_s29 = sphi %s2309_s29, %s2673_s29  }
   0xe   : > { %s2334_s19 = sadd.s32 1, %s2217_s16   ;;  %s326_s20 = sadd.s32 1, %s2213_s15 }
   0xf   : > { %s323_s21 = ssub.s32 %s2217_s16, %s2334_s19  ;;  %p336_p0 = scmp.ne.s32.totalorder %s2213_s15, %s2209_s30 }
  0x10   : > { %p324_p1 = scmp.eq.s32.totalorder %s323_s21, 0  ;;  %p337_p2 = scmp.eq.s32.totalorder %s2330_s17, 1 }
  0x11   : > { %p342_p3 = scmp.ne.s32.totalorder %s2209_s30, %s2205_s29  ;;  %p343_p4 = scmp.eq.s32.totalorder %s1847_s18, 1 }
  0x12   : > { %s2345_s22 = scalar_select %p324_p1, %s2213_s15, %s326_s20  }
  0x13   : > { %p2347_p5 = por %p337_p2, %p336_p0  ;;  %p2351_p6 = por %p343_p4, %p342_p3 }
  0x14   : > { %p1850_p7 = scmp.ge.s32.totalorder %s2217_s16, 1  ;;  %p436_p8 = scmp.lt.s32.totalorder %s2217_s16, 3 }
  0x16   : > { %p437_p9 = pnand %p1850_p7, %p436_p8 }
  0x17   : > { %p492_p10 = scmp.lt.s32.totalorder (!%p437_p9), %s2330_s17, 1  ;;  %s2664_s0 = sld [smem:[#allocation8_spill]] (!%p437_p9) }
  0x18   : > { %440 = sbr.rel (%p437_p9) target bundleno = 4050 (0xfd2), region = 72  ;;  %s2665_s3 = sld [smem:[#allocation11_spill]] (!%p437_p9) }
  0x19   : > { %s2666_s1 = sld [smem:[#allocation9_spill]] (!%p437_p9)  ;;  %s2223_s21 = smov (!%p437_p9), 88  }
  0x1a   : > { %s2667_s2 = sld [smem:[#allocation10_spill]] (!%p437_p9)  ;;  %s2489_s28 = sand.u32 (!%p437_p9), 1, %s2209_s30  }
  0x1b   : > { %s2668_s4 = sld [smem:[#allocation12_spill]] (!%p437_p9) }
  0x1c   : > { %s2669_s5 = sld [smem:[#allocation13_spill]] (!%p437_p9) }
  0x1d   : > { %s2359_s25 = scalar_select %p492_p10, %s2330_s17, 1  ;;  %vm504_vm0 = vcmask 261120   ;;  %v2219_v8 = vmov 0.0   ;;  %vm2220_vm1 = vmmov 0   ;;  %v522_v13 = vlaneseq }
  0x1e   : > { %v2093_v7 = vld [vmem:[%s2665_s3 + $0x8] sm:$0xff]   ;;  %1936 = vmatprep.subr.bf16.mxu0 %v2219_v8  ;;  %1940 = vmatprep.mubr.msk.bf16.mxu0 %vm2220_vm1, %v2219_v8  ;;  %v2094_v9 = vld [vmem:[%s2665_s3] sm:$0xff]   ;;  %vm614_vm2 = vcmask 64512   ;;  %vm786_vm3 = vcmask 1043456   ;;  %s2670_s6 = sld [smem:[#allocation14_spill]] }
  0x1f   : > { %s1853_s26 = sshll.u32 %s2359_s25, 3  ;;  %1937 = vmatpush3.bf16.msra.mxu0 %v2093_v7  ;;  %1949 = vmatprep.subr.mxu1 %v2219_v8  ;;  %s498_s20 = scalar_lea.vmem %s2666_s1, %s2359_s25  ;;  %v523_v14 = vshrl.u32 %v522_v13, 7 }
  0x20   : > { %s495_s18 = scalar_lea.vmem %s2664_s0, %s1853_s26  ;;  %1938 = vmatprep.subr.bf16.mxu0 %v2219_v8  ;;  %1951 = vmatprep.mubr.msk.f32.mxu1 %vm2220_vm1, %v2219_v8  ;;  %v519_v15 = vld [vmem:[%s498_s20] sm:$0x1]  ;;  %s501_s27 = scalar_lea.vmem %s2667_s2, %s2359_s25 }
  0x21   : > { %v2365_v0 = vld [vmem:[%s495_s18] sm:$0xff]  ;;  %v520_v16 = vadd.f32 1.0, %v519_v15  ;;  %v524_v17 = vsub.s32 0, %v523_v14  ;;  %s2221_s25 = smov 96   ;;  %s2222_s20 = smov 64  }
  0x22   : > { %v505_v1 = vsel %vm504_vm0, %v2365_v0, 0.0  ;;  %v1854_v21 = vld [vmem:[%s501_s27] ss:$0 sm:$0xff]  ;;  %s2224_s26 = smov 120   ;;  %s2225_s18 = smov 56  }
  0x23   : > { %506 = vadd.xlane.f32.xlu0 %v505_v1  ;;  %1939 = vmatpush3.bf16.msra.mxu0 %v2094_v9  ;;  %v525_v18 = vrot.slane %v520_v16, %v524_v17  ;;  %v1855_v25 = vld [vmem:[%s2668_s4] ss:$0 sm:$0xff]  ;;  %v1002_v15 = vld [vmem:[%s2669_s5 + $0x4] sm:$0xf]  ;;  %s2228_s27 = smov 48   ;;  %s2654_s0 = sshll.u32 %s2330_s17, 7 }
  0x24   : > { %1944 = vmatprep.subr.mxu0 %v2219_v8  ;;  %v782_v41 = vld [vmem:[%s2669_s5] sm:$0xf]  ;;  %v1007_v16 = vsel %vm786_vm3, %v1002_v15, 0  ;;  %s1736_s2 = scalar_lea.hbm %s2652_s14, %s2654_s0 }
  0x25   : > { %v788_v42 = vsel %vm786_vm3, %v782_v41, 0 }
  0xac   : > { %v507_v2 = vpop.xlane.xlu0 %506 }
  0xad   : > { %v509_v3 = vmul.f32 0.03125, %v507_v2 }
  0xaf   : > { %v510_v4 = vsub.f32 %v2365_v0, %v509_v3 }
  0xb1   : > { %v511_v5 = vmul.f32 %v510_v4, %v510_v4 }
  0xb3   : > { %v512_v6 = vsel %vm504_vm0, %v511_v5, 0.0 }
  0xb4   : > { %513 = vadd.xlane.f32.xlu0 %v512_v6 }
 0x13d   : > { %v514_v10 = vpop.xlane.xlu0 %513 }
 0x13e   : > { %v515_v11 = vmul.f32 0.03125, %v514_v10 }
 0x140   : > { %v516_v12 = vadd.f32 1e-05, %v515_v11 }
 0x142   : > { %2105 = vrsqrt.f32 %v516_v12 }
 0x14f   : > { %v2106_v19 = vpop.eup %2105 }
 0x150   : > { %v518_v20 = vmul.f32 %v2106_v19, %v510_v4 }
 0x152   : > { %v527_v22 = vmul.f32 %v525_v18, %v518_v20 }
 0x154   : > { %v535_v23 = vadd.f32 %v1854_v21, %v527_v22 }
 0x156   : > { %v536_v24 = vpack.c.bf16 %v535_v23, %v535_v23 }
 0x158   : > { %1941 = vmatmul.mubr.msk.bf16.vlgmr.msra.gmra.mxu0 %vm504_vm0, %v536_v24 }
 0x159   : > { %1946 = vmatprep.mubr.msk.f32.mxu0 %vm2220_vm1, %v2219_v8 }
 0x218   : > { %v597_v26 = vpop.f32.mrf.mxu0 }
 0x219   : > { %v2399_v27 = vadd.f32 %v1855_v25, %v597_v26 }
 0x21a   : > { %v1942_v28 = vpop.f32.mrf.mxu0 }
 0x21b   : > { %612 = vrot.lane.b32.xlu1 %v2399_v27, %s2221_s25  ;;  %s2226_s25 = smov 80  }
 0x21c   : > { %v600_v29 = vpop.f32.mrf.mxu0 }
 0x21e   : > { %v1943_v30 = vpop.f32.mrf.mxu0 }
 0x21f   : > { %v1859_v30 = vld [vmem:[%s2670_s6] ss:$0 sm:$0xff] }
 0x28d   : > { %v613_v31 = vpop.permute.xlu1 %612 }
 0x28e   : > { %1945 = vmatpush3.xpose.msk.msra.mxu0 %vm614_vm2, %v613_v31 }
 0x28f   : > { %1954 = vmatprep.subr.bf16.mxu0 %v2219_v8 }
 0x291   : > { %1947 = vmatmul.mubr.msk.f32.vlgmr.msra.gmra.mxu0 %vm614_vm2, %v2399_v27 }
 0x292   : > { %1956 = vmatprep.mubr.msk.bf16.mxu0 %vm2220_vm1, %v2219_v8  ;;  %1955 = vmatpush3.bf16.msra.mxu0 %v788_v42 }
 0x293   : > { %1960 = vmatprep.subr.mxu0 %v2219_v8 }
 0x351   : > { %v685_v32 = vpop.f32.mrf.mxu0 }
 0x352   : > { %v689_v33 = vmul.f32 0.35355338, %v685_v32 }
 0x353   : > { %v1948_v34 = vpop.f32.mrf.mxu0 }
 0x354   : > { %v690_v35 = vsel %vm614_vm2, %v689_v33, -inf }
 0x355   : > { %691 = vmax.xlane.f32.xlu1 %v690_v35 }
 0x3de   : > { %v692_v36 = vpop.xlane.xlu1 %691 }
 0x3df   : > { %v693_v37 = vsub.f32 %v689_v33, %v692_v36 }
 0x3e1   : > { %v694_v38 = vmul.f32 1.442695, %v693_v37 }
 0x3e3   : > { %2107 = vpow2.f32 %v694_v38 }
 0x3f0   : > { %v2108_v39 = vpop.eup %2107 }
 0x3f1   : > { %v696_v40 = vsel %vm614_vm2, %v2108_v39, 0.0 }
 0x3f2   : > { %697 = vadd.xlane.f32.xlu0 %v696_v40 }
 0x408   : > { %705 = vrot.lane.b32.xlu0 %v2399_v27, %s2222_s20  ;;  %s2227_s20 = smov 112  }
 0x40c   : > { %833 = vrot.lane.b32.xlu0 %v2399_v27, %s2223_s21  ;;  %s1712_s21 = scalar_lea.sflag [#allocation5], %s2489_s28 }
 0x410   : > { %831 = vrot.lane.b32.xlu0 %v2399_v27, %s2224_s26 }
 0x47b   : > { %v698_v43 = vpop.xlane.xlu0 %697 }
 0x47c   : > { %2109 = vrcp.f32 %v698_v43 }
 0x47f   : > { %v706_v44 = vpop.permute.xlu0 %705 }
 0x480   : > { %1950 = vmatpush3.msra.mxu1 %v706_v44 }
 0x481   : > { %1970 = vmatprep.subr.bf16.mxu1 %v2219_v8 }
 0x483   : > { %v834_v53 = vpop.permute.xlu0 %833 }
 0x487   : > { %v832_v54 = vpop.permute.xlu0 %831 }
 0x489   : > { %v2110_v45 = vpop.eup %2109 }
 0x48a   : > { %v700_v46 = vmul.f32 %v2110_v45, %v698_v43 }
 0x48c   : > { %v701_v47 = vsub.f32 2.0, %v700_v46 }
 0x48e   : > { %v702_v48 = vmul.f32 %v2110_v45, %v701_v47 }
 0x490   : > { %v2419_v49 = vmul.f32 %v2108_v39, %v702_v48  ;;  %v1221_v48 = vld [vmem:[%s2669_s5 + $0x8] sm:$0xf] }
 0x492   : > { %1952 = vmatmul.mubr.msk.f32.vlgmr.msra.gmra.mxu1 %vm614_vm2, %v2419_v49 }
 0x493   : > { %1972 = vmatprep.mubr.msk.bf16.mxu1 %vm2220_vm1, %v2219_v8  ;;  %1971 = vmatpush3.bf16.msra.mxu1 %v1007_v16 }
 0x494   : > { %1986 = vmatprep.subr.bf16.mxu1 %v2219_v8 }
 0x552   : > { %v777_v50 = vpop.f32.mrf.mxu1 }
 0x553   : > { %v781_v51 = vpack.c.bf16 %v777_v50, %v777_v50 }
 0x554   : > { %v1953_v52 = vpop.f32.mrf.mxu1 }
 0x555   : > { %1957 = vmatmul.mubr.msk.bf16.vlgmr.msra.gmra.mxu0 %vm614_vm2, %v781_v51 }
 0x556   : > { %1961 = vmatpush3.xpose.msk.msra.mxu0 %vm614_vm2, %v834_v53  ;;  %1962 = vmatprep.mubr.msk.f32.mxu0 %vm2220_vm1, %v2219_v8 }
 0x557   : > { %1965 = vmatprep.subr.mxu0 %v2219_v8 }
 0x55d   : > { %1963 = vmatmul.mubr.msk.f32.vlgmr.msra.gmra.mxu0 %vm614_vm2, %v832_v54 }
 0x55e   : > { %1967 = vmatprep.mubr.msk.f32.mxu0 %vm2220_vm1, %v2219_v8 }
 0x615   : > { %v2433_v55 = vpop.f32.mrf.mxu0 }
 0x616   : > { %v830_v31 = vadd.f32 %v1859_v30, %v2433_v55 }
 0x617   : > { %v1958_v56 = vpop.f32.mrf.mxu0 }
 0x619   : > { %v827_v57 = vpop.f32.mrf.mxu0 }
 0x61b   : > { %v1959_v58 = vpop.f32.mrf.mxu0 }
 0x61d   : > { %v905_v59 = vpop.f32.mrf.mxu0 }
 0x61e   : > { %v909_v60 = vmul.f32 0.35355338, %v905_v59 }
 0x61f   : > { %v1964_v61 = vpop.f32.mrf.mxu0 }
 0x620   : > { %v910_v62 = vsel %vm614_vm2, %v909_v60, -inf }
 0x621   : > { %911 = vmax.xlane.f32.xlu1 %v910_v62 }
 0x632   : > { %925 = vrot.lane.b32.xlu1 %v2399_v27, %s2225_s18  ;;  %s2653_s18 = sshll.u32 %s2489_s28, 3 }
 0x636   : > { %1052 = vrot.lane.b32.xlu1 %v2399_v27, %s2226_s25  ;;  %s2229_s25 = smov 72  }
 0x63a   : > { %1050 = vrot.lane.b32.xlu1 %v2399_v27, %s2227_s20  ;;  %s2230_s20 = smov 104  }
 0x6aa   : > { %v912_v63 = vpop.xlane.xlu1 %911 }
 0x6ab   : > { %v913_v1 = vsub.f32 %v909_v60, %v912_v63 }
 0x6ad   : > { %v914_v2 = vmul.f32 1.442695, %v913_v1 }
 0x6ae   : > { %v926_v3 = vpop.permute.xlu1 %925 }
 0x6af   : > { %2111 = vpow2.f32 %v914_v2  ;;  %1966 = vmatpush3.msra.mxu0 %v926_v3 }
 0x6b0   : > { %1976 = vmatprep.subr.mxu0 %v2219_v8 }
 0x6b2   : > { %v1053_v12 = vpop.permute.xlu1 %1052 }
 0x6b6   : > { %v1051_v14 = vpop.permute.xlu1 %1050 }
 0x6bc   : > { %v2112_v4 = vpop.eup %2111 }
 0x6bd   : > { %v916_v5 = vsel %vm614_vm2, %v2112_v4, 0.0 }
 0x6be   : > { %917 = vadd.xlane.f32.xlu0 %v916_v5 }
 0x747   : > { %v918_v6 = vpop.xlane.xlu0 %917 }
 0x748   : > { %2113 = vrcp.f32 %v918_v6 }
 0x755   : > { %v2114_v7 = vpop.eup %2113 }
 0x756   : > { %v920_v9 = vmul.f32 %v2114_v7, %v918_v6 }
 0x758   : > { %v921_v10 = vsub.f32 2.0, %v920_v9 }
 0x75a   : > { %v922_v11 = vmul.f32 %v2114_v7, %v921_v10 }
 0x75c   : > { %v923_v13 = vmul.f32 %v2112_v4, %v922_v11 }
 0x75e   : > { %1968 = vmatmul.mubr.msk.f32.vlgmr.msra.gmra.mxu0 %vm614_vm2, %v923_v13  ;;  %v924_v44 = vadd.f32 %v923_v13, %v2419_v49  ;;  %v1226_v49 = vsel %vm786_vm3, %v1221_v48, 0  ;;  %v1440_v13 = vld [vmem:[%s2669_s5 + $0xc] sm:$0xf] }
 0x75f   : > { %1977 = vmatpush3.xpose.msk.msra.mxu0 %vm614_vm2, %v1053_v12  ;;  %1978 = vmatprep.mubr.msk.f32.mxu0 %vm2220_vm1, %v2219_v8  ;;  %v2103_v48 = vld [vmem:[%s2649_s11 + $0x8] sm:$0xff]  }
 0x760   : > { %1981 = vmatprep.subr.mxu0 %v2219_v8 }
 0x762   : > { %1979 = vmatmul.mubr.msk.f32.vlgmr.msra.gmra.mxu0 %vm614_vm2, %v1051_v14  ;;  %v1445_v14 = vsel %vm786_vm3, %v1440_v13, 0 }
 0x763   : > { %1983 = vmatprep.mubr.msk.f32.mxu0 %vm2220_vm1, %v2219_v8 }
 0x81e   : > { %v997_v17 = vpop.f32.mrf.mxu0 }
 0x81f   : > { %v1001_v18 = vpack.c.bf16 %v997_v17, %v997_v17 }
 0x820   : > { %v1969_v19 = vpop.f32.mrf.mxu0 }
 0x821   : > { %1973 = vmatmul.mubr.msk.bf16.vlgmr.msra.gmra.mxu1 %vm614_vm2, %v1001_v18 }
 0x822   : > { %v1124_v20 = vpop.f32.mrf.mxu0  ;;  %1988 = vmatprep.mubr.msk.bf16.mxu1 %vm2220_vm1, %v2219_v8  ;;  %1987 = vmatpush3.bf16.msra.mxu1 %v1226_v49  ;;  %v2104_v49 = vld [vmem:[%s2649_s11] sm:$0xff]  }
 0x823   : > { %v1128_v21 = vmul.f32 0.35355338, %v1124_v20  ;;  %2002 = vmatprep.subr.bf16.mxu1 %v2219_v8 }
 0x824   : > { %v1980_v22 = vpop.f32.mrf.mxu0 }
 0x825   : > { %v1129_v23 = vsel %vm614_vm2, %v1128_v21, -inf }
 0x826   : > { %1130 = vmax.xlane.f32.xlu1 %v1129_v23 }
 0x8af   : > { %v1131_v24 = vpop.xlane.xlu1 %1130 }
 0x8b0   : > { %v1132_v25 = vsub.f32 %v1128_v21, %v1131_v24 }
 0x8b2   : > { %v1133_v26 = vmul.f32 1.442695, %v1132_v25 }
 0x8b4   : > { %2115 = vpow2.f32 %v1133_v26 }
 0x8c1   : > { %v2116_v28 = vpop.eup %2115 }
 0x8c2   : > { %v1135_v29 = vsel %vm614_vm2, %v2116_v28, 0.0 }
 0x8c3   : > { %1136 = vadd.xlane.f32.xlu0 %v1135_v29 }
 0x8d9   : > { %1144 = vrot.lane.b32.xlu0 %v2399_v27, %s2228_s27  ;;  %s2231_s27 = smov 40  }
 0x8dd   : > { %1271 = vrot.lane.b32.xlu0 %v2399_v27, %s2229_s25  ;;  %s2497_s25 = scalar_lea.vmem [#allocation4], %s2653_s18 }
 0x8e1   : > { %v1043_v32 = vpop.f32.mrf.mxu1  ;;  %1269 = vrot.lane.b32.xlu0 %v2399_v27, %s2230_s20  ;;  %s1738_s20 = sshll.u32 %s2497_s25, 4  ;;  %s1739_s20 = int_to_ptr.vmem [resolvable:$true] %s1738_s20 }
 0x8e2   : > { %v1049_v33 = vadd.f32 %v1043_v32, %v830_v31  ;;  %v2095_v31 = vld [vmem:[%s2647_s9 + $0x8] sm:$0xff]   ;;  %v2097_v32 = vld [vmem:[%s2649_s11 + $0x38] sm:$0xff]   ;;  %s2127_s26 = scalar_lea.vmem %s1739_s20, 128 }
 0x8e3   : > { %v1974_v34 = vpop.f32.mrf.mxu1  ;;  %p2128_p11 = scmp.ne.s32.totalorder %s1739_s20, %s2127_s26 }
 0x8e5   : > { %v1046_v35 = vpop.f32.mrf.mxu1  ;;  %p2129_p12 = pnand %p2128_p11, %p2347_p5 }
 0x8e7   : > { %v1975_v36 = vpop.f32.mrf.mxu1  ;;  %p2130_p13 = pneg %p2129_p12 }
 0x94c   : > { %v1137_v37 = vpop.xlane.xlu0 %1136 }
 0x94d   : > { %2117 = vrcp.f32 %v1137_v37 }
 0x950   : > { %v1145_v38 = vpop.permute.xlu0 %1144 }
 0x951   : > { %1982 = vmatpush3.msra.mxu0 %v1145_v38  ;;  %v1876_v38 = vld [vmem:[%s2645_s7] ss:$0 sm:$0xff] }
 0x952   : > { %1992 = vmatprep.subr.mxu0 %v2219_v8 }
 0x954   : > { %v1272_v43 = vpop.permute.xlu0 %1271 }
 0x958   : > { %v1270_v47 = vpop.permute.xlu0 %1269 }
 0x95a   : > { %v2118_v39 = vpop.eup %2117 }
 0x95b   : > { %v1139_v40 = vmul.f32 %v2118_v39, %v1137_v37 }
 0x95d   : > { %v1140_v41 = vsub.f32 2.0, %v1139_v40  ;;  %v1877_v40 = vld [vmem:[%s2646_s8] ss:$0 sm:$0xff] }
 0x95f   : > { %v1141_v42 = vmul.f32 %v2118_v39, %v1140_v41 }
 0x961   : > { %v1142_v45 = vmul.f32 %v2116_v28, %v1141_v42 }
 0x963   : > { %v1143_v46 = vadd.f32 %v1142_v45, %v924_v44  ;;  %1984 = vmatmul.mubr.msk.f32.vlgmr.msra.gmra.mxu0 %vm614_vm2, %v1142_v45  ;;  %v2099_v44 = vld [vmem:[%s2649_s11 + $0x28] sm:$0xff]   ;;  %v2100_v45 = vld [vmem:[%s2649_s11 + $0x20] sm:$0xff]  }
 0x964   : > { %1993 = vmatpush3.xpose.msk.msra.mxu0 %vm614_vm2, %v1272_v43  ;;  %1994 = vmatprep.mubr.msk.f32.mxu0 %vm2220_vm1, %v2219_v8 }
 0x965   : > { %1997 = vmatprep.subr.mxu0 %v2219_v8 }
 0x967   : > { %1995 = vmatmul.mubr.msk.f32.vlgmr.msra.gmra.mxu0 %vm614_vm2, %v1270_v47  ;;  %v2102_v47 = vld [vmem:[%s2649_s11 + $0x10] sm:$0xff]  }
 0x968   : > { %1999 = vmatprep.mubr.msk.f32.mxu0 %vm2220_vm1, %v2219_v8 }
 0xa23   : > { %v1216_v50 = vpop.f32.mrf.mxu0 }
 0xa24   : > { %v1220_v51 = vpack.c.bf16 %v1216_v50, %v1216_v50  ;;  %v1878_v50 = vld [vmem:[%s2648_s10] ss:$0 sm:$0xff] }
 0xa25   : > { %v1985_v52 = vpop.f32.mrf.mxu0 }
 0xa26   : > { %1989 = vmatmul.mubr.msk.bf16.vlgmr.msra.gmra.mxu1 %vm614_vm2, %v1220_v51 }
 0xa27   : > { %v1343_v53 = vpop.f32.mrf.mxu0  ;;  %2004 = vmatprep.mubr.msk.bf16.mxu1 %vm2220_vm1, %v2219_v8  ;;  %2003 = vmatpush3.bf16.msra.mxu1 %v1445_v14 }
 0xa28   : > { %v1347_v54 = vmul.f32 0.35355338, %v1343_v53  ;;  %2016 = vmatprep.subr.bf16.mxu1 %v2219_v8 }
 0xa29   : > { %v1996_v55 = vpop.f32.mrf.mxu0 }
 0xa2a   : > { %v1348_v56 = vsel %vm614_vm2, %v1347_v54, -inf }
 0xa2b   : > { %1349 = vmax.xlane.f32.xlu1 %v1348_v56 }
 0xa3c   : > { %1363 = vrot.lane.b32.xlu1 %v2399_v27, %s2231_s27  ;;  %s2232_s27 = smov [#allocation4]  }
 0xa3d   : > { %s2131_s3 = sshll.u32 %s2232_s27, 4  ;;  %s2132_s3 = int_to_ptr.vmem [resolvable:$false] %s2131_s3 }
 0xa3e   : > { %s2133_s4 = scalar_lea.vmem %s2132_s3, 256  ;;  %p2134_p0 = scmp.lt.s32.totalorder %s1739_s20, %s2132_s3 }
 0xa3f   : > { %p2135_p1 = scmp.lt.s32.totalorder %s2133_s4, %s2127_s26 }
 0xa41   : > { %p2136_p2 = por %p2135_p1, %p2134_p0 }
 0xa43   : > { %p2137_p3 = pnand %p2136_p2, %p2130_p13 }
 0xab4   : > { %v1350_v57 = vpop.xlane.xlu1 %1349 }
 0xab5   : > { %v1351_v58 = vsub.f32 %v1347_v54, %v1350_v57 }
 0xab7   : > { %v1352_v59 = vmul.f32 1.442695, %v1351_v58 }
 0xab8   : > { %v1364_v60 = vpop.permute.xlu1 %1363 }
 0xab9   : > { %2119 = vpow2.f32 %v1352_v59  ;;  %1998 = vmatpush3.msra.mxu0 %v1364_v60 }
 0xaba   : > { %2008 = vmatprep.subr.bf16.mxu0 %v2219_v8 }
 0xac6   : > { %v2120_v61 = vpop.eup %2119 }
 0xac7   : > { %v1354_v62 = vsel %vm614_vm2, %v2120_v61, 0.0 }
 0xac8   : > { %1355 = vadd.xlane.f32.xlu0 %v1354_v62 }
 0xae6   : > { %v1262_v63 = vpop.f32.mrf.mxu1 }
 0xae7   : > { %v1268_v1 = vadd.f32 %v1262_v63, %v1049_v33  ;;  %v2098_v33 = vld [vmem:[%s2649_s11 + $0x30] sm:$0xff]  }
 0xae8   : > { %v1990_v2 = vpop.f32.mrf.mxu1 }
 0xaea   : > { %v1265_v3 = vpop.f32.mrf.mxu1 }
 0xaec   : > { %v1991_v4 = vpop.f32.mrf.mxu1 }
 0xb51   : > { %v1356_v5 = vpop.xlane.xlu0 %1355 }
 0xb52   : > { %2121 = vrcp.f32 %v1356_v5 }
 0xb5f   : > { %v2122_v27 = vpop.eup %2121 }
 0xb60   : > { %v1358_v6 = vmul.f32 %v2122_v27, %v1356_v5 }
 0xb62   : > { %v1359_v7 = vsub.f32 2.0, %v1358_v6 }
 0xb64   : > { %v1360_v9 = vmul.f32 %v2122_v27, %v1359_v7 }
 0xb66   : > { %v1361_v10 = vmul.f32 %v2120_v61, %v1360_v9 }
 0xb68   : > { %v1362_v11 = vadd.f32 %v1361_v10, %v1143_v46  ;;  %2000 = vmatmul.mubr.msk.f32.vlgmr.msra.gmra.mxu0 %vm614_vm2, %v1361_v10  ;;  %v2101_v46 = vld [vmem:[%s2649_s11 + $0x18] sm:$0xff]  }
 0xb69   : > { %2012 = vmatprep.mubr.msk.bf16.mxu0 %vm2220_vm1, %v2219_v8  ;;  %2009 = vmatpush3.bf16.msra.mxu0 %v2095_v31 }
 0xb6a   : > { %v1488_v12 = vmul.f32 0.25, %v1362_v11  ;;  %2010 = vmatprep.subr.bf16.mxu0 %v2219_v8 }
 0xb6c   : > { %1489 = vst.msk [vmem:[%s2497_s25] sm:$0xff] %vm614_vm2, %v1488_v12 }
 0xc28   : > { %v1435_v15 = vpop.f32.mrf.mxu0 }
 0xc29   : > { %v1439_v16 = vpack.c.bf16 %v1435_v15, %v1435_v15 }
 0xc2a   : > { %v2001_v17 = vpop.f32.mrf.mxu0 }
 0xc2b   : > { %2005 = vmatmul.mubr.msk.bf16.vlgmr.msra.gmra.mxu1 %vm614_vm2, %v1439_v16 }
 0xc2c   : > { %2032 = vmatprep.mubr.msk.bf16.mxu1 %vm2220_vm1, %v2219_v8  ;;  %2017 = vmatpush3.bf16.msra.mxu1 %v2097_v32 }
 0xc2d   : > { %2018 = vmatprep.subr.bf16.mxu1 %v2219_v8 }
 0xc30   : > { %2019 = vmatpush3.bf16.msra.mxu1 %v2098_v33 }
 0xc31   : > { %2020 = vmatprep.subr.bf16.mxu1 %v2219_v8 }
 0xc34   : > { %2021 = vmatpush3.bf16.msra.mxu1 %v2099_v44 }
 0xc35   : > { %2022 = vmatprep.subr.bf16.mxu1 %v2219_v8 }
 0xc38   : > { %2023 = vmatpush3.bf16.msra.mxu1 %v2100_v45 }
 0xc39   : > { %2024 = vmatprep.subr.bf16.mxu1 %v2219_v8 }
 0xc3c   : > { %2025 = vmatpush3.bf16.msra.mxu1 %v2101_v46 }
 0xc3d   : > { %2026 = vmatprep.subr.bf16.mxu1 %v2219_v8 }
 0xc40   : > { %2027 = vmatpush3.bf16.msra.mxu1 %v2102_v47 }
 0xc41   : > { %2028 = vmatprep.subr.bf16.mxu1 %v2219_v8 }
 0xc44   : > { %2029 = vmatpush3.bf16.msra.mxu1 %v2103_v48 }
 0xc45   : > { %2030 = vmatprep.subr.bf16.mxu1 %v2219_v8 }
 0xc48   : > { %2031 = vmatpush3.bf16.msra.mxu1 %v2104_v49 }
 0xceb   : > { %v1481_v18 = vpop.f32.mrf.mxu1 }
 0xcec   : > { %v1487_v19 = vadd.f32 %v1481_v18, %v1268_v1 }
 0xced   : > { %v2006_v20 = vpop.f32.mrf.mxu1 }
 0xcee   : > { %v2510_v21 = vadd.f32 %v1487_v19, %v2365_v0  ;;  %v2096_v0 = vld [vmem:[%s2647_s9] sm:$0xff]  }
 0xcef   : > { %v1484_v22 = vpop.f32.mrf.mxu1  ;;  %2011 = vmatpush3.bf16.msra.mxu0 %v2096_v0 }
 0xcf0   : > { %v1491_v23 = vsel %vm504_vm0, %v2510_v21, 0.0 }
 0xcf1   : > { %1492 = vadd.xlane.f32.xlu1 %v1491_v23  ;;  %v2007_v24 = vpop.f32.mrf.mxu1 }
 0xd7a   : > { %v1493_v25 = vpop.xlane.xlu1 %1492 }
 0xd7b   : > { %v1494_v26 = vmul.f32 0.03125, %v1493_v25 }
 0xd7d   : > { %v1495_v28 = vsub.f32 %v2510_v21, %v1494_v26 }
 0xd7f   : > { %v1496_v29 = vmul.f32 %v1495_v28, %v1495_v28 }
 0xd81   : > { %v1497_v30 = vsel %vm504_vm0, %v1496_v29, 0.0 }
 0xd82   : > { %1498 = vadd.xlane.f32.xlu0 %v1497_v30 }
 0xe0b   : > { %v1499_v34 = vpop.xlane.xlu0 %1498 }
 0xe0c   : > { %v1500_v35 = vmul.f32 0.03125, %v1499_v34 }
 0xe0e   : > { %v1501_v36 = vadd.f32 1e-05, %v1500_v35 }
 0xe10   : > { %2123 = vrsqrt.f32 %v1501_v36 }
 0xe1d   : > { %v2124_v37 = vpop.eup %2123 }
 0xe1e   : > { %v1503_v39 = vmul.f32 %v2124_v37, %v1495_v28 }
 0xe20   : > { %v1511_v41 = vmul.f32 %v1876_v38, %v1503_v39 }
 0xe22   : > { %v1519_v42 = vadd.f32 %v1877_v40, %v1511_v41 }
 0xe24   : > { %v1520_v43 = vpack.c.bf16 %v1519_v42, %v1519_v42 }
 0xe26   : > { %2013 = vmatmul.mubr.msk.bf16.vlgmr.msra.gmra.mxu0 %vm504_vm0, %v1520_v43 }
 0xee6   : > { %v1581_v51 = vpop.f32.mrf.mxu0 }
 0xee7   : > { %v1582_v52 = vadd.f32 %v1878_v50, %v1581_v51 }
 0xee8   : > { %v2014_v53 = vpop.f32.mrf.mxu0 }
 0xee9   : > { %v1588_v54 = vmul.f32 0.70710677, %v1582_v52  ;;  %v1587_v57 = vmul.f32 0.5, %v1582_v52 }
 0xeea   : > { %v1584_v55 = vpop.f32.mrf.mxu0 }
 0xeeb   : > { %2125 = verf.f32 %v1588_v54 }
 0xeec   : > { %v2015_v8 = vpop.f32.mrf.mxu0 }
 0xef8   : > { %v2126_v56 = vpop.eup %2125 }
 0xef9   : > { %v1590_v58 = vadd.f32 1.0, %v2126_v56 }
 0xefb   : > { %v1591_v59 = vmul.f32 %v1590_v58, %v1587_v57 }
 0xefd   : > { %v1592_v60 = vpack.c.bf16 %v1591_v59, %v1591_v59 }
 0xeff   : > { %2033 = vmatmul.mubr.bf16.vlgmr.msra.gmra.mxu1 %v1592_v60 }
 0xf00   : > { %2140 = shalt.err (!%p2137_p3)
}
 0xf01   : > { %s2141_s5 = scalar_lea.hbm %s1736_s2, 128  ;;  %s2145_s1 = scalar_lea.hbm %s2652_s14, 256 }
 0xf02   : > { %p2142_p4 = scmp.ne.s32.totalorder %s1736_s2, %s2141_s5  ;;  %p2146_p9 = scmp.lt.s32.totalorder %s1736_s2, %s2652_s14 }
 0xf03   : > { %p2147_p10 = scmp.lt.s32.totalorder %s2145_s1, %s2141_s5 }
 0xf04   : > { %p2143_p7 = pnand %p2142_p4, %p2347_p5 }
 0xf05   : > { %p2148_p11 = por %p2147_p10, %p2146_p9 }
 0xf06   : > { %p2144_p8 = pneg %p2143_p7 }
 0xf08   : > { %p2149_p12 = pnand %p2148_p11, %p2144_p8 }
 0xf0a   : > { %2152 = shalt.err (!%p2149_p12)
}
 0xf0b   : > { %2037 = dma.vmem_to_hbm [thread:$0]  (%p2347_p5), %s1739_s20, 128, %s1736_s2, %s1712_s21   ;;  %v1882_v61 = vld [vmem:[%s2650_s12] ss:$0 sm:$0xff] }
 0xf0c   : > { %s2671_s26 = sshll.u32 %s2489_s28, 3  ;;  %s2672_s5 = sshll.u32 %s2330_s17, 7 }
 0xf0d   : > { %s484_s27 = scalar_lea.vmem [#allocation2], %s2671_s26  ;;  %s2595_s18 = scalar_lea.hbm %s2651_s13, %s2672_s5 }
 0xf0e   : > { %s1725_s6 = sshll.u32 %s484_s27, 4  ;;  %s1707_s2 = scalar_lea.sflag [#allocation3], %s2489_s28  ;;  %s2597_s6 = int_to_ptr.vmem [resolvable:$true] %s1725_s6 }
 0xf0f   : > { %s2153_s20 = scalar_lea.vmem %s2597_s6, 128  ;;  %s2233_s17 = smov [#allocation2]  }
 0xf10   : > { %p2154_p13 = scmp.ne.s32.totalorder %s2597_s6, %s2153_s20  ;;  %s2157_s21 = sshll.u32 %s2233_s17, 4  ;;  %s2158_s21 = int_to_ptr.vmem [resolvable:$false] %s2157_s21 }
 0xf11   : > { %s2159_s1 = scalar_lea.vmem %s2158_s21, 256  ;;  %p2160_p2 = scmp.lt.s32.totalorder %s2597_s6, %s2158_s21 }
 0xf12   : > { %p2155_p0 = pnand %p2154_p13, %p2347_p5  ;;  %p2161_p3 = scmp.lt.s32.totalorder %s2159_s1, %s2153_s20 }
 0xf14   : > { %p2156_p1 = pneg %p2155_p0  ;;  %p2162_p4 = por %p2161_p3, %p2160_p2 }
 0xf16   : > { %p2163_p7 = pnand %p2162_p4, %p2156_p1 }
 0xfbf   : > { %v1698_v62 = vpop.f32.mrf.mxu1 }
 0xfc0   : > { %v1699_v63 = vadd.f32 %v1882_v61, %v1698_v62 }
 0xfc1   : > { %v2034_v1 = vpop.f32.mrf.mxu1 }
 0xfc2   : > { %v1704_v2 = vadd.f32 %v1699_v63, %v2510_v21 }
 0xfc3   : > { %v1701_v3 = vpop.f32.mrf.mxu1 }
 0xfc4   : > { %1705 = vst.msk [vmem:[%s484_s27] sm:$0xff] %vm504_vm0, %v1704_v2 }
 0xfc5   : > { %v2035_v4 = vpop.f32.mrf.mxu1 }
 0xfc6   : > { %2166 = shalt.err (!%p2163_p7)
}
 0xfc7   : > { %s2167_s3 = scalar_lea.hbm %s2595_s18, 128  ;;  %s2171_s26 = scalar_lea.hbm %s2651_s13, 256 }
 0xfc8   : > { %p2168_p8 = scmp.ne.s32.totalorder %s2595_s18, %s2167_s3  ;;  %p2172_p11 = scmp.lt.s32.totalorder %s2595_s18, %s2651_s13 }
 0xfc9   : > { %p2173_p12 = scmp.lt.s32.totalorder %s2171_s26, %s2167_s3 }
 0xfca   : > { %p2169_p9 = pnand %p2168_p8, %p2347_p5 }
 0xfcb   : > { %p2174_p13 = por %p2173_p12, %p2172_p11 }
 0xfcc   : > { %p2170_p10 = pneg %p2169_p9 }
 0xfce   : > { %p2175_p0 = pnand %p2174_p13, %p2170_p10 }
 0xfd0   : > { %2178 = shalt.err (!%p2175_p0)
}
 0xfd1   : > { %2036 = dma.vmem_to_hbm [thread:$0]  (%p2347_p5), %s2597_s6, 128, %s2595_s18, %s1707_s2  }
 0xfd2 PF: > { %p2047_p1 = scmp.ge.s32.totalorder %s2217_s16, 2  ;;  %s1750_s0 = sand.u32 1, %s2205_s29  }
 0xfd3   : > { %s1751_s25 = scalar_lea.sflag [#allocation3], %s1750_s0 }
 0xfd4   : > { %p2041_p2 = pnand %p2047_p1, %p2351_p6 }
 0xfd6   : > { %p2042_p3 = pneg %p2041_p2 }
 0xfd8   : > { %2196 = dma.done.wait (%p2042_p3), %s1751_s25, 128  }
 0xfd9   : > { %2198 = vsyncadd (%p2042_p3), %s1751_s25, 4294967168  ;;  %s1760_s20 = scalar_lea.sflag [#allocation5], %s1750_s0 }
 0xfda   : > { %2200 = dma.done.wait (%p2042_p3), %s1760_s20, 128  }
 0xfdb   : > { %2202 = vsyncadd (%p2042_p3), %s1760_s20, 4294967168  ;;  %p28_p5 = scmp.ge.s32.totalorder %s2334_s19, 4   ;;  %s2673_s29 = smov %s2209_s30 }
 0xfdc   : > { %s2674_s30 = smov %s2213_s15  ;;  %s2675_s15 = smov %s2345_s22 }
 0xfdd   : > { %s2676_s16 = smov %s2334_s19  ;;  %30 = sbr.rel (!%p28_p5) target bundleno = 13 (0xd), region = 130 }
 0xfe2   :  { %1765 = vsyncpa [#allocation3], 1 }
 0xfe3   :  { %1767 = vsyncpa [#allocation3 + $0x1], 1 }
 0xfe4   :  { %1768 = vsyncpa [#allocation5], 1 }
 0xfe5   :  { %1770 = vsyncpa [#allocation5 + $0x1], 1 }

</bundles_post_ra>
